<compile_context>
chip_gen: v7x
topology: tpu7x:2x2x1
jax: 0.10.0
libtpu: 0.0.40
codegen_flags: <defaults>
</compile_context>

<pallas_src>
import jax
import jax.numpy as jnp
from jax.experimental import pallas as pl
from jax.experimental.pallas import tpu as pltpu


def _round_up(x, m):
    return (x + m - 1) // m * m


def _merged_linear_kernel(x_ref, w_ref, b_ref, aft_ref, bt_ref, o_ref, acc_ref):
    # x_ref:   (TM, TK)    token tile (compute dtype, e.g. bf16)
    # w_ref:   (TK, TN)    Conv1D weight tile
    # b_ref:   (1, TN)     Conv1D bias tile (f32)
    # aft_ref: (TM, RPAD)  precomputed after_A = dropout(x) @ A^T tile
    # bt_ref:  (RPAD, TN)  scaling * B^T tile
    # o_ref:   (TM, TN)    output tile
    # acc_ref: (TM, TN)    f32 accumulator, persistent across the K axis
    k = pl.program_id(2)

    @pl.when(k == 0)
    def _():
        # Bias + LoRA contribution are K-independent: fold them into the init.
        acc_ref[...] = b_ref[...] + jnp.dot(
            aft_ref[...], bt_ref[...], preferred_element_type=jnp.float32)

    acc_ref[...] += jnp.dot(x_ref[...], w_ref[...],
                            preferred_element_type=jnp.float32)

    @pl.when(k == pl.num_programs(2) - 1)
    def _():
        o_ref[...] = acc_ref[...].astype(o_ref.dtype)


def _base_linear_kernel(x_ref, w_ref, b_ref, o_ref, acc_ref):
    # Plain Conv1D path (lora_r == 0, or LoRA merged into W on the host).
    k = pl.program_id(2)

    @pl.when(k == 0)
    def _():
        acc_ref[...] = jnp.broadcast_to(b_ref[...], acc_ref.shape)

    acc_ref[...] += jnp.dot(x_ref[...], w_ref[...],
                            preferred_element_type=jnp.float32)

    @pl.when(k == pl.num_programs(2) - 1)
    def _():
        o_ref[...] = acc_ref[...].astype(o_ref.dtype)


def mydp_merged_linear(x, conv1d_w, conv1d_b, lora_a_w=None, lora_b_w=None,
                       lora_alpha=1.0, lora_r=0, *, tm=512, tn=512, tk=512,
                       compute_dtype=jnp.bfloat16, merge_lora=False):
    """x: (batch, seq, in_features) -> (batch, seq, out_features)."""
    batch, seq, in_features = x.shape
    out_features = conv1d_w.shape[1]
    n_tokens = batch * seq
    out_dtype = x.dtype

    use_lora = (lora_r is not None) and (lora_r > 0) and \
               (lora_a_w is not None) and (lora_b_w is not None)
    scaling = (float(lora_alpha) / float(lora_r)) if use_lora else 0.0

    # ---- tile selection (clamped to the padded problem size) ----
    tm = max(16, min(int(tm), _round_up(n_tokens, 16)))         # bf16 sublane mult
    n_pad = _round_up(n_tokens, tm)
    tn = max(128, min(int(tn), _round_up(out_features, 128)))   # lane-dense output
    out_pad = _round_up(out_features, tn)
    tk = max(128, min(int(tk), _round_up(in_features, 128)))    # K tile
    in_pad = _round_up(in_features, tk)

    # ---- host-side packing / padding / casting (one time) ----
    x2d = x.reshape(n_tokens, in_features)

    wp = conv1d_w.astype(jnp.float32)
    use_lora_kernel = use_lora
    if use_lora and merge_lora:
        # Frozen-LoRA inference: fold LoRA into W and use the base kernel.
        wp = wp + scaling * jnp.dot(lora_a_w.T.astype(jnp.float32),
                                    lora_b_w.T.astype(jnp.float32))
        use_lora_kernel = False

    bp = conv1d_b.reshape(1, out_features).astype(jnp.float32)

    xp = jnp.pad(x2d, ((0, n_pad - n_tokens), (0, in_pad - in_features)))
    xp = xp.astype(compute_dtype)
    wp = jnp.pad(wp, ((0, in_pad - in_features), (0, out_pad - out_features)))
    wp = wp.astype(compute_dtype)
    bp = jnp.pad(bp, ((0, 0), (0, out_pad - out_features)))

    if use_lora_kernel:
        r = lora_a_w.shape[0]
        r_pad = _round_up(max(r, 1), 16)
        # after_A = dropout(x) @ A^T (p=0 -> identity). Tiny (n_tokens, r)
        # matmul computed once in f32 outside the kernel instead of being
        # recomputed for every output-column tile inside it.
        # TODO(synk): lora_dropout with p>0 (training mode) not implemented;
        #             would use pltpu.prng_seed/prng_random_bits in-kernel.
        after_a = jnp.dot(x2d.astype(jnp.float32), lora_a_w.T.astype(jnp.float32))
        after_a = jnp.pad(after_a, ((0, n_pad - n_tokens), (0, r_pad - r)))
        after_a = after_a.astype(compute_dtype)
        bt = scaling * lora_b_w.T.astype(jnp.float32)           # (r, out)
        bt = jnp.pad(bt, ((0, r_pad - r), (0, out_pad - out_features)))
        bt = bt.astype(compute_dtype)
    else:
        r_pad = 0

    # ---- cost / VMEM bookkeeping ----
    cbytes = jnp.dtype(compute_dtype).itemsize
    obytes = jnp.dtype(out_dtype).itemsize
    gi, gj, gk = n_pad // tm, out_pad // tn, in_pad // tk

    flops = 2 * n_pad * in_pad * out_pad
    bytes_accessed = (n_pad * in_pad * cbytes * gj      # x re-streamed per j
                      + in_pad * out_pad * cbytes * gi  # W re-streamed per i
                      + out_pad * 4
                      + n_pad * out_pad * obytes)

    vmem_est = (2 * (tm * tk + tk * tn) * cbytes         # double-buffered x, W
                + 2 * tn * 4                             # bias
                + 2 * tm * tn * obytes                   # output
                + tm * tn * 4                            # f32 accumulator
                + (2 << 20))                             # slack
    if use_lora_kernel:
        flops += 2 * n_pad * r_pad * out_pad
        bytes_accessed += (n_pad * r_pad * cbytes * gj
                           + r_pad * out_pad * cbytes * gi)
        vmem_est += 2 * (tm * r_pad + r_pad * tn) * cbytes

    # Cap below v7x's 64 MiB physical VMEM to leave compiler scratch headroom.
    vmem_limit = int(min(max(vmem_est, 32 << 20), 56 << 20))

    compiler_params = pltpu.CompilerParams(
        dimension_semantics=("parallel", "parallel", "arbitrary"),
        vmem_limit_bytes=vmem_limit)
    cost = pl.CostEstimate(flops=int(flops), transcendentals=0,
                           bytes_accessed=int(bytes_accessed))

    grid = (gi, gj, gk)
    out_shape = jax.ShapeDtypeStruct((n_pad, out_pad), out_dtype)
    out_spec = pl.BlockSpec((tm, tn), lambda i, j, k: (i, j))
    scratch = [pltpu.VMEM((tm, tn), jnp.float32)]

    if use_lora_kernel:
        out2d = pl.pallas_call(
            _merged_linear_kernel,
            out_shape=out_shape,
            grid_spec=pltpu.PrefetchScalarGridSpec(
                num_scalar_prefetch=0,
                grid=grid,
                in_specs=[
                    pl.BlockSpec((tm, tk), lambda i, j, k: (i, k)),     # x tile
                    pl.BlockSpec((tk, tn), lambda i, j, k: (k, j)),     # W tile
                    pl.BlockSpec((1, tn), lambda i, j, k: (0, j)),      # bias
                    pl.BlockSpec((tm, r_pad), lambda i, j, k: (i, 0)),  # after_A
                    pl.BlockSpec((r_pad, tn), lambda i, j, k: (0, j)),  # scaled B^T
                ],
                out_specs=out_spec,
                scratch_shapes=scratch),
            compiler_params=compiler_params,
            cost_estimate=cost,
        )(xp, wp, bp, after_a, bt)
    else:
        out2d = pl.pallas_call(
            _base_linear_kernel,
            out_shape=out_shape,
            grid_spec=pltpu.PrefetchScalarGridSpec(
                num_scalar_prefetch=0,
                grid=grid,
                in_specs=[
                    pl.BlockSpec((tm, tk), lambda i, j, k: (i, k)),
                    pl.BlockSpec((tk, tn), lambda i, j, k: (k, j)),
                    pl.BlockSpec((1, tn), lambda i, j, k: (0, j)),
                ],
                out_specs=out_spec,
                scratch_shapes=scratch),
            compiler_params=compiler_params,
            cost_estimate=cost,
        )(xp, wp, bp)

    out2d = out2d[:n_tokens, :out_features]
    return out2d.reshape(batch, seq, out_features)


def _reference(x, conv1d_w, conv1d_b, lora_a_w, lora_b_w, lora_alpha, lora_r):
    base = jnp.einsum("bsi,io->bso", x, conv1d_w) + conv1d_b
    if lora_r and lora_r > 0:
        scaling = lora_alpha / lora_r
        lora = jnp.einsum("bsr,or->bso",
                          jnp.einsum("bsi,ri->bsr", x, lora_a_w), lora_b_w)
        base = base + scaling * lora
    return base


if __name__ == "__main__":
    key = jax.random.PRNGKey(0)
    batch, seq = 2, 8
    in_features, out_features, lora_r = 32, 64, 8
    lora_alpha = 16.0

    k_x, k_w, k_b, k_a, k_bb = jax.random.split(key, 5)
    x = jax.random.normal(k_x, (batch, seq, in_features), dtype=jnp.float32)

    # Conv1D weight (in, out), bias (out,).
    conv1d_w = 0.02 * jax.random.normal(k_w, (in_features, out_features), jnp.float32)
    conv1d_b = 0.01 * jax.random.normal(k_b, (out_features,), jnp.float32)
    # lora_A.weight: (r, in) — kaiming-style init (nn.Linear.reset_parameters).
    lora_a_w = jax.random.normal(k_a, (lora_r, in_features), jnp.float32) / jnp.sqrt(in_features)
    # lora_B.weight: (out, r) — zero-initialized in the module; use small nonzero
    # values so the LoRA branch is actually exercised.
    lora_b_w = 0.05 * jax.random.normal(k_bb, (out_features, lora_r), jnp.float32)

    ref = _reference(x, conv1d_w, conv1d_b, lora_a_w, lora_b_w, lora_alpha, lora_r)

    # LoRA-enabled (unmerged) path.
    out = mydp_merged_linear(x, conv1d_w, conv1d_b, lora_a_w, lora_b_w,
                             lora_alpha=lora_alpha, lora_r=lora_r)
    out = jax.block_until_ready(out)
    assert out.shape == (batch, seq, out_features)
    # bf16 operands with f32 accumulation -> looser tolerance vs. f32 reference.
    assert jnp.allclose(out, ref, atol=3e-2, rtol=5e-2), "mismatch vs reference (lora)"

    # Frozen-LoRA inference path (weights merged on the host, base kernel).
    out_m = mydp_merged_linear(x, conv1d_w, conv1d_b, lora_a_w, lora_b_w,
                               lora_alpha=lora_alpha, lora_r=lora_r, merge_lora=True)
    out_m = jax.block_until_ready(out_m)
    assert jnp.allclose(out_m, ref, atol=3e-2, rtol=5e-2), "mismatch vs reference (merged)"

    # lora_r == 0 path (module semantics: no LoRA branch, no divide-by-zero).
    out0 = mydp_merged_linear(x, conv1d_w, conv1d_b, lora_r=0)
    out0 = jax.block_until_ready(out0)
    ref0 = _reference(x, conv1d_w, conv1d_b, None, None, lora_alpha, 0)
    assert jnp.allclose(out0, ref0, atol=3e-2, rtol=5e-2), "mismatch vs reference (base)"

    print("KERNEL_OK")
</pallas_src>

<mosaic_0001>
module attributes {stable_mosaic.version = 11 : i64} {
  func.func @_merged_linear_kernel(%arg0: i32, %arg1: i32, %arg2: i32, %arg3: memref<16x128xbf16, #tpu.memory_space<vmem>>, %arg4: memref<128x128xbf16, #tpu.memory_space<vmem>>, %arg5: memref<1x128xf32, #tpu.memory_space<vmem>>, %arg6: memref<16x16xbf16, #tpu.memory_space<vmem>>, %arg7: memref<16x128xbf16, #tpu.memory_space<vmem>>, %arg8: memref<16x128xf32, #tpu.memory_space<vmem>>, %arg9: memref<16x128xf32, #tpu.memory_space<vmem>>) attributes {dimension_semantics = [#tpu.dimension_semantics<parallel>, #tpu.dimension_semantics<parallel>, #tpu.dimension_semantics<arbitrary>], iteration_bounds = array<i64: 1, 1, 1>, scalar_prefetch = 0 : i64, scratch_operands = 1 : i64, tpu.core_type = #tpu.core_type<tc>, window_params = [{transform_indices = @transform_0, window_bounds = array<i64: 16, 128>}, {transform_indices = @transform_1, window_bounds = array<i64: 128, 128>}, {transform_indices = @transform_2, window_bounds = array<i64: 1, 128>}, {transform_indices = @transform_3, window_bounds = array<i64: 16, 16>}, {transform_indices = @transform_4, window_bounds = array<i64: 16, 128>}, {transform_indices = @transform_5, window_bounds = array<i64: 16, 128>}]} {
    %c0_i32 = arith.constant 0 : i32
    %0 = arith.cmpi eq, %arg2, %c0_i32 : i32
    %1 = arith.extui %0 : i1 to i32
    %c0_i32_0 = arith.constant 0 : i32
    %2 = arith.cmpi ne, %1, %c0_i32_0 : i32
    scf.if %2 {
      %c0_10 = arith.constant 0 : index
      %c0_11 = arith.constant 0 : index
      %12 = vector.load %arg5[%c0_10, %c0_11] : memref<1x128xf32, #tpu.memory_space<vmem>>, vector<1x128xf32>
      %c0_12 = arith.constant 0 : index
      %c0_13 = arith.constant 0 : index
      %13 = vector.load %arg6[%c0_12, %c0_13] : memref<16x16xbf16, #tpu.memory_space<vmem>>, vector<16x16xbf16>
      %c0_14 = arith.constant 0 : index
      %c0_15 = arith.constant 0 : index
      %14 = vector.load %arg7[%c0_14, %c0_15] : memref<16x128xbf16, #tpu.memory_space<vmem>>, vector<16x128xbf16>
      %cst_16 = arith.constant dense<0.000000e+00> : vector<16x128xf32>
      %15 = tpu.matmul %13, %14, %cst_16 {dimension_numbers = #tpu.dot_dimension_numbers<[1], [0], [0], [1], [0, 0, 1, 1], [], []>} : vector<16x16xbf16>, vector<16x128xbf16>, vector<16x128xf32> -> vector<16x128xf32>
      %16 = vector.broadcast %12 : vector<1x128xf32> to vector<16x128xf32>
      %17 = arith.addf %16, %15 : vector<16x128xf32>
      %c0_17 = arith.constant 0 : index
      %c0_18 = arith.constant 0 : index
      %18 = vector.load %arg9[%c0_17, %c0_18] : memref<16x128xf32, #tpu.memory_space<vmem>>, vector<16x128xf32>
      tpu.vector_store %arg9[%c0_17, %c0_18], %17 {strides = array<i32>} : memref<16x128xf32, #tpu.memory_space<vmem>>, vector<16x128xf32>,
    } else {
    }
    %c0 = arith.constant 0 : index
    %c0_1 = arith.constant 0 : index
    %3 = vector.load %arg9[%c0, %c0_1] : memref<16x128xf32, #tpu.memory_space<vmem>>, vector<16x128xf32>
    %c0_2 = arith.constant 0 : index
    %c0_3 = arith.constant 0 : index
    %4 = vector.load %arg3[%c0_2, %c0_3] : memref<16x128xbf16, #tpu.memory_space<vmem>>, vector<16x128xbf16>
    %c0_4 = arith.constant 0 : index
    %c0_5 = arith.constant 0 : index
    %5 = vector.load %arg4[%c0_4, %c0_5] : memref<128x128xbf16, #tpu.memory_space<vmem>>, vector<128x128xbf16>
    %cst = arith.constant dense<0.000000e+00> : vector<16x128xf32>
    %6 = tpu.matmul %4, %5, %cst {dimension_numbers = #tpu.dot_dimension_numbers<[1], [0], [0], [1], [0, 0, 1, 1], [], []>} : vector<16x128xbf16>, vector<128x128xbf16>, vector<16x128xf32> -> vector<16x128xf32>
    %7 = arith.addf %3, %6 : vector<16x128xf32>
    %c0_6 = arith.constant 0 : index
    %c0_7 = arith.constant 0 : index
    %8 = vector.load %arg9[%c0_6, %c0_7] : memref<16x128xf32, #tpu.memory_space<vmem>>, vector<16x128xf32>
    tpu.vector_store %arg9[%c0_6, %c0_7], %7 {strides = array<i32>} : memref<16x128xf32, #tpu.memory_space<vmem>>, vector<16x128xf32>,
    %c0_i32_8 = arith.constant 0 : i32
    %9 = arith.cmpi eq, %arg2, %c0_i32_8 : i32
    %10 = arith.extui %9 : i1 to i32
    %c0_i32_9 = arith.constant 0 : i32
    %11 = arith.cmpi ne, %10, %c0_i32_9 : i32
    scf.if %11 {
      %c0_10 = arith.constant 0 : index
      %c0_11 = arith.constant 0 : index
      %12 = vector.load %arg9[%c0_10, %c0_11] : memref<16x128xf32, #tpu.memory_space<vmem>>, vector<16x128xf32>
      %c0_12 = arith.constant 0 : index
      %c0_13 = arith.constant 0 : index
      %13 = vector.load %arg8[%c0_12, %c0_13] : memref<16x128xf32, #tpu.memory_space<vmem>>, vector<16x128xf32>
      tpu.vector_store %arg8[%c0_12, %c0_13], %12 {strides = array<i32>} : memref<16x128xf32, #tpu.memory_space<vmem>>, vector<16x128xf32>,
    } else {
    }
    return
  }
  func.func @transform_0(%arg0: i32, %arg1: i32, %arg2: i32) -> (i32, i32) {
    %c0_i32 = arith.constant 0 : i32
    return %arg0, %arg2 : i32, i32
  }
  func.func @transform_1(%arg0: i32, %arg1: i32, %arg2: i32) -> (i32, i32) {
    %c0_i32 = arith.constant 0 : i32
    return %arg2, %arg1 : i32, i32
  }
  func.func @transform_2(%arg0: i32, %arg1: i32, %arg2: i32) -> (i32, i32) {
    %c0_i32 = arith.constant 0 : i32
    %c0_i32_0 = arith.constant 0 : i32
    return %c0_i32, %arg1 : i32, i32
  }
  func.func @transform_3(%arg0: i32, %arg1: i32, %arg2: i32) -> (i32, i32) {
    %c0_i32 = arith.constant 0 : i32
    %c0_i32_0 = arith.constant 0 : i32
    return %arg0, %c0_i32 : i32, i32
  }
  func.func @transform_4(%arg0: i32, %arg1: i32, %arg2: i32) -> (i32, i32) {
    %c0_i32 = arith.constant 0 : i32
    %c0_i32_0 = arith.constant 0 : i32
    return %c0_i32, %arg1 : i32, i32
  }
  func.func @transform_5(%arg0: i32, %arg1: i32, %arg2: i32) -> (i32, i32) {
    %c0_i32 = arith.constant 0 : i32
    return %arg0, %arg1 : i32, i32
  }
}

</mosaic_0001>

<bundles_post_ra>
// kernel: tpu_custom_call.1
= control target key start
LH: loop header
LB: loop body
LE: loop exit
PB: predicated region body
PF: predicated region fallthrough
CT: control target
= control target key end

     0   :  { %10 = vsyncpa [#allocation4], 0  ;;  %s561_s0 = inlined_call_operand.hbm [shape: bf16[16,128], index: 0, kind: input, shape index: {}]   ;;  %s562_s1 = inlined_call_operand.hbm [shape: bf16[128,128], index: 1, kind: input, shape index: {}]   ;;  %s563_s2 = inlined_call_operand.vmem [shape: f32[1,128], index: 2, kind: input, shape index: {}]   ;;  %s564_s3 = inlined_call_operand.vmem [shape: bf16[16,16], index: 3, kind: input, shape index: {}]   ;;  %s565_s4 = inlined_call_operand.hbm [shape: bf16[16,128], index: 4, kind: input, shape index: {}]   ;;  %s566_s5 = inlined_call_operand.hbm [shape: f32[16,128], index: 5, kind: output, shape index: {}]  }
   0x1   :  { %11 = vsyncpa [#allocation7], 0 }
   0x2   :  { %12 = vsyncpa [#allocation5], 0  ;;  %s451_s18 = smov [#allocation6]   ;;  %s452_s20 = smov [#allocation3]  }
   0x3   :  { %s30_s19 = sshll.u32 %s451_s18, 4  ;;  %s18_s21 = sshll.u32 %s452_s20, 4  ;;  %s31_s19 = int_to_ptr.vmem [resolvable:$true] %s30_s19  ;;  %s491_s21 = int_to_ptr.vmem [resolvable:$true] %s18_s21 }
   0x4   :  { %s357_s24 = scalar_lea.hbm %s562_s1, 1024 }
   0x5   :  { %p358_p0 = scmp.ne.s32.totalorder %s562_s1, %s357_s24  ;;  %p361_p1 = scmp.lt.u32.totalorder %s357_s24, %s562_s1 }
   0x7   :  { %p363_p2 = pnand %p361_p1, %p358_p0 }
   0x9   :  { %366 = shalt.err (!%p363_p2)
}
   0xa   :  { %s367_s29 = scalar_lea.vmem %s31_s19, 1024  ;;  %p372_p4 = scmp.lt.s32.totalorder %s31_s19, %s31_s19 }
   0xb   :  { %p368_p3 = scmp.ne.s32.totalorder %s31_s19, %s367_s29  ;;  %p373_p5 = scmp.lt.s32.totalorder %s367_s29, %s367_s29 }
   0xd   :  { %p374_p6 = por %p373_p5, %p372_p4 }
   0xf   :  { %p375_p7 = pnand %p374_p6, %p368_p3 }
  0x11   :  { %378 = shalt.err (!%p375_p7)
}
  0x12   :  { %s453_s30 = smov 64   ;;  %s454_s6 = smov 4  }
  0x13   :  { %36 = dma.hbm_to_vmem [thread:$0]  %s562_s1, 1024, %s31_s19, [#allocation7], %s453_s30, %s453_s30, %s454_s6  }
  0x14   :  { %s379_s11 = scalar_lea.hbm %s561_s0, 128 }
  0x15   :  { %p380_p8 = scmp.ne.s32.totalorder %s561_s0, %s379_s11  ;;  %p383_p9 = scmp.lt.u32.totalorder %s379_s11, %s561_s0 }
  0x17   :  { %p385_p10 = pnand %p383_p9, %p380_p8 }
  0x19   :  { %388 = shalt.err (!%p385_p10)
}
  0x1a   :  { %s389_s16 = scalar_lea.vmem %s491_s21, 128  ;;  %p394_p12 = scmp.lt.s32.totalorder %s491_s21, %s491_s21 }
  0x1b   :  { %p390_p11 = scmp.ne.s32.totalorder %s491_s21, %s389_s16  ;;  %p395_p13 = scmp.lt.s32.totalorder %s389_s16, %s389_s16 }
  0x1d   :  { %p396_p0 = por %p395_p13, %p394_p12 }
  0x1f   :  { %p397_p1 = pnand %p396_p0, %p390_p11 }
  0x21   :  { %400 = shalt.err (!%p397_p1)
}
  0x22   :  { %24 = dma.hbm_to_vmem [thread:$0]  %s561_s0, 128, %s491_s21, [#allocation4], %s453_s30, %s453_s30, %s454_s6  }
  0x23   :  { %s455_s18 = smov [#allocation8]   ;;  %s401_s23 = scalar_lea.hbm %s565_s4, 128 }
  0x24   :  { %s46_s19 = sshll.u32 %s455_s18, 4  ;;  %p402_p2 = scmp.ne.s32.totalorder %s565_s4, %s401_s23  ;;  %s47_s19 = int_to_ptr.vmem [resolvable:$true] %s46_s19 }
  0x25   :  { %p405_p3 = scmp.lt.u32.totalorder %s401_s23, %s565_s4 }
  0x27   :  { %p407_p4 = pnand %p405_p3, %p402_p2 }
  0x29   :  { %410 = shalt.err (!%p407_p4)
}
  0x2a   :  { %s411_s28 = scalar_lea.vmem %s47_s19, 128  ;;  %p416_p6 = scmp.lt.s32.totalorder %s47_s19, %s47_s19 }
  0x2b   :  { %p412_p5 = scmp.ne.s32.totalorder %s47_s19, %s411_s28  ;;  %p417_p7 = scmp.lt.s32.totalorder %s411_s28, %s411_s28 }
  0x2d   :  { %p418_p8 = por %p417_p7, %p416_p6 }
  0x2f   :  { %p419_p9 = pnand %p418_p8, %p412_p5 }
  0x31   :  { %422 = shalt.err (!%p419_p9)
}
  0x32   :  { %52 = dma.hbm_to_vmem [thread:$0]  %s565_s4, 128, %s47_s19, [#allocation7], %s453_s30, %s453_s30, %s454_s6  }
  0x33   :  { %445 = dma.done.wait [#allocation4], 128  }
  0x34   :  { %446 = vsyncadd [#allocation4], 4294967168 }
  0x35   :  { %447 = dma.done.wait [#allocation7], 1152  }
  0x36   :  { %448 = vsyncadd [#allocation7], 4294966144  ;;  %v456_v0 = vmov 0.0   ;;  %vm457_vm0 = vmmov 0   ;;  %v346_v1 = vld [vmem:[#allocation6] sm:$0xff]   ;;  %v347_v2 = vld [vmem:[#allocation6 + $0x8] sm:$0xff]  }
  0x37   :  { %312 = vmatprep.subr.bf16.mxu0 %v456_v0  ;;  %306 = vmatprep.subr.bf16.mxu1 %v456_v0  ;;  %v348_v3 = vld [vmem:[#allocation6 + $0x10] sm:$0xff]   ;;  %v352_v4 = vld [vmem:[#allocation8] sm:$0xff]   ;;  %v354_v5 = vld [vmem:[%s564_s3] sm:$0xff]   ;;  %vm83_vm1 = vcmask 130048   ;;  %s458_s6 = smov [#allocation9]  }
  0x38   :  { %308 = vmatprep.mubr.msk.bf16.mxu1 %vm457_vm0, %v456_v0  ;;  %328 = vmatprep.mubr.msk.bf16.mxu0 %vm457_vm0, %v456_v0  ;;  %v349_v6 = vld [vmem:[#allocation6 + $0x18] sm:$0xff]   ;;  %v350_v7 = vld [vmem:[#allocation6 + $0x20] sm:$0xff]   ;;  %v351_v8 = vld [vmem:[#allocation6 + $0x28] sm:$0xff]   ;;  %s269_s7 = sshll.u32 %s458_s6, 4  ;;  %s270_s7 = int_to_ptr.vmem [resolvable:$true] %s269_s7 }
  0x39   :  { %313 = vmatpush3.bf16.msra.mxu0 %v346_v1  ;;  %307 = vmatpush3.bf16.msra.mxu1 %v352_v4  ;;  %v353_v9 = vld [vmem:[#allocation6 + $0x30] sm:$0xff]   ;;  %v355_v10 = vld [vmem:[#allocation6 + $0x38] sm:$0xff]   ;;  %s423_s8 = scalar_lea.vmem %s270_s7, 256  ;;  %p428_p11 = scmp.lt.s32.totalorder %s270_s7, %s270_s7 }
  0x3a   :  { %314 = vmatprep.subr.bf16.mxu0 %v456_v0  ;;  %v356_v11 = vld [vmem:[#allocation3] sm:$0xff]   ;;  %p424_p10 = scmp.ne.s32.totalorder %s270_s7, %s423_s8  ;;  %p429_p12 = scmp.lt.s32.totalorder %s423_s8, %s423_s8 }
  0x3b   :  { %v285_v16 = vld [vmem:[%s563_s2] ss:$0 sm:$0xff] }
  0x3c   :  { %309 = vmatmul.mubr.msk.bf16.vlgmr.msra.gmra.mrb[0].mxu1 %vm83_vm1, %v354_v5  ;;  %p430_p13 = por %p429_p12, %p428_p11 }
  0x3d   :  { %315 = vmatpush3.bf16.msra.mxu0 %v347_v2 }
  0x3e   :  { %316 = vmatprep.subr.bf16.mxu0 %v456_v0  ;;  %p431_p0 = pnand %p430_p13, %p424_p10 }
  0x41   :  { %317 = vmatpush3.bf16.msra.mxu0 %v348_v3 }
  0x42   :  { %318 = vmatprep.subr.bf16.mxu0 %v456_v0 }
  0x45   :  { %319 = vmatpush3.bf16.msra.mxu0 %v349_v6 }
  0x46   :  { %320 = vmatprep.subr.bf16.mxu0 %v456_v0 }
  0x49   :  { %321 = vmatpush3.bf16.msra.mxu0 %v350_v7 }
  0x4a   :  { %322 = vmatprep.subr.bf16.mxu0 %v456_v0 }
  0x4d   :  { %323 = vmatpush3.bf16.msra.mxu0 %v351_v8 }
  0x4e   :  { %324 = vmatprep.subr.bf16.mxu0 %v456_v0 }
  0x51   :  { %325 = vmatpush3.bf16.msra.mxu0 %v353_v9 }
  0x52   :  { %326 = vmatprep.subr.bf16.mxu0 %v456_v0 }
  0x55   :  { %327 = vmatpush3.bf16.msra.mxu0 %v355_v10 }
  0x58   :  { %329 = vmatmul.mubr.bf16.vlgmr.msra.gmra.mrb[0].mxu0 %v356_v11 }
 0x10f   :  { %v121_v12 = vpop.f32.mrb[0].mxu1 }
 0x110   :  { %v310_v13 = vpop.f32.mrb[1].mxu1  ;;  %v134_v17 = vadd.f32 %v285_v16, %v121_v12 }
 0x111   :  { %v124_v14 = vpop.f32.mrb[2].mxu1 }
 0x112   :  { %v311_v15 = vpop.f32.mrb[3].mxu1  ;;  %v135_v19 = vadd.f32 %v285_v16, %v124_v14 }
 0x12b   :  { %v246_v18 = vpop.f32.mrb[0].mxu0 }
 0x12c   :  { %v253_v20 = vadd.f32 %v246_v18, %v134_v17  ;;  %v330_v21 = vpop.f32.mrb[1].mxu0 }
 0x12d   :  { %v249_v22 = vpop.f32.mrb[2].mxu0 }
 0x12e   :  { %262 = vst [vmem:[#allocation9] sm:$0xff] %v253_v20  ;;  %v254_v23 = vadd.f32 %v249_v22, %v135_v19  ;;  %v331_v24 = vpop.f32.mrb[3].mxu0 }
 0x130   :  { %263 = vst [vmem:[#allocation9 + $0x8] sm:$0xff] %v254_v23 }
 0x131   :  { %434 = shalt.err (!%p431_p0)
}
 0x132   :  { %s435_s10 = scalar_lea.hbm %s566_s5, 256 }
 0x133   :  { %p436_p1 = scmp.ne.s32.totalorder %s566_s5, %s435_s10  ;;  %p439_p2 = scmp.lt.u32.totalorder %s435_s10, %s566_s5 }
 0x135   :  { %p441_p3 = pnand %p439_p2, %p436_p1 }
 0x137   :  { %444 = shalt.err (!%p441_p3)
}
 0x138   :  { %s459_s15 = smov 128   ;;  %s460_s16 = smov 8  }
 0x139   :  { %275 = dma.vmem_to_hbm [thread:$0]  %s270_s7, 256, %s566_s5, [#allocation5], %s459_s15, %s459_s15, %s460_s16  }
 0x13a   :  { %449 = dma.done.wait [#allocation5], 256  }
 0x13b   :  { %450 = vsyncadd [#allocation5], 4294967040 }
 0x13c   :  { %279 = vsyncpa [#allocation4], 1 }
 0x13d   :  { %280 = vsyncpa [#allocation7], 1 }
 0x13e   :  { %281 = vsyncpa [#allocation5], 1 }

</bundles_post_ra>
